<compile_context>
chip_gen: v7x
topology: tpu7x:2x2x1
jax: 0.10.0
libtpu: 0.0.40
codegen_flags: <defaults>
</compile_context>

<pallas_src>
import jax
import jax.numpy as jnp
from jax.experimental import pallas as pl
from jax.experimental.pallas import tpu as pltpu

H_PAD = 128   # hidden lanes zero-padded to one full vreg lane width


def _num_batch_tiles():
    """One grid step per TensorCore: 2 on v7x (2 TCs/chip), 1 on v5e/v6e."""
    try:
        kind = jax.devices()[0].device_kind.lower()
        return 2 if ("v7" in kind or "7x" in kind) else 1
    except Exception:
        return 1


NUM_TILES = _num_batch_tiles()


def mlp_kernel(x_ref, w1_ref, b1_ref, w2_ref, b2_ref, o_ref):
    x = x_ref[...]                                   # (tile_m, 2)
    # Layer 1 (contraction depth 2): two VPU broadcast-FMAs, kept off the MXU.
    h = (x[:, 0:1] * w1_ref[0:1, :]
         + x[:, 1:2] * w1_ref[1:2, :]
         + b1_ref[...])                              # (tile_m, H_PAD)
    h = jnp.maximum(h, 0.0)
    # Layer 2: one MXU push with K=128 (zero-padded hidden rows contribute 0);
    # N equals the real n_output, so only the real columns are computed/stored.
    o = jnp.dot(h, w2_ref[...], preferred_element_type=jnp.float32) + b2_ref[...]
    o_ref[...] = o.astype(o_ref.dtype)


def pad_params(w1, b1, w2, b2):
    """Zero-pad parameters ONCE at init (exact: relu(0)=0 meets zero W2 rows)."""
    f, h = w1.shape
    o = w2.shape[1]
    assert h <= H_PAD
    w1_p = jnp.zeros((f, H_PAD), jnp.float32).at[:, :h].set(w1)
    b1_p = jnp.zeros((1, H_PAD), jnp.float32).at[:, :h].set(b1)
    w2_p = jnp.zeros((H_PAD, o), jnp.float32).at[:h, :].set(w2)
    b2_p = b2.reshape(1, o).astype(jnp.float32)
    return w1_p, b1_p, w2_p, b2_p


@jax.jit
def net_forward(x, w1_p, b1_p, w2_p, b2_p):
    """x: (N, 2); parameters pre-padded by pad_params (called once at init)."""
    n, f = x.shape
    o = w2_p.shape[1]

    # Round rows up to a multiple of 8*NUM_TILES so each tile is a legal
    # (mult-of-8, f) block; one grid step per TensorCore.
    row_quant = 8 * NUM_TILES
    n_pad = pl.cdiv(n, row_quant) * row_quant
    tile_m = n_pad // NUM_TILES
    x_p = x if n_pad == n else jnp.zeros((n_pad, f), x.dtype).at[:n, :].set(x)

    out = pl.pallas_call(
        mlp_kernel,
        out_shape=jax.ShapeDtypeStruct((n_pad, o), jnp.float32),
        grid=(NUM_TILES,),
        in_specs=[
            pl.BlockSpec((tile_m, f), lambda i: (i, 0)),     # x row tile
            pl.BlockSpec((f, H_PAD), lambda i: (0, 0)),      # W1 (resident)
            pl.BlockSpec((1, H_PAD), lambda i: (0, 0)),      # b1
            pl.BlockSpec((H_PAD, o), lambda i: (0, 0)),      # W2 (128 x 2)
            pl.BlockSpec((1, o), lambda i: (0, 0)),          # b2
        ],
        out_specs=pl.BlockSpec((tile_m, o), lambda i: (i, 0)),
        compiler_params=pltpu.CompilerParams(
            dimension_semantics=("parallel",),   # one tile per TC on v7x
        ),
    )(x_p, w1_p, b1_p, w2_p, b2_p)

    return out[:n, :]


def init_linear(key, fan_in, fan_out):
    """Deterministic init mirroring torch.nn.Linear default (uniform +-1/sqrt(fan_in))."""
    kw, kb = jax.random.split(key)
    bound = 1.0 / jnp.sqrt(jnp.float32(fan_in))
    # stored as (fan_in, fan_out), i.e. transpose of PyTorch's (out, in) weight
    w = jax.random.uniform(kw, (fan_in, fan_out), jnp.float32, -bound, bound)
    b = jax.random.uniform(kb, (1, fan_out), jnp.float32, -bound, bound)
    return w, b


if __name__ == "__main__":
    key = jax.random.PRNGKey(0)
    k_x0, k_x1, k_l1, k_l2 = jax.random.split(key, 4)

    # Shapes from the spec: n_feature=2, n_hidden=32, n_output=2,
    # full synthetic dataset of 200 samples per class (400 total).
    n_feature, n_hidden, n_output = 2, 32, 2
    batch_per_class = 200

    # Two-blob data, analogous to torch.normal(+-2*ones, 1).
    ones = jnp.ones((batch_per_class, n_feature), jnp.float32)
    x0 = 2.0 * ones + jax.random.normal(k_x0, ones.shape, jnp.float32)
    x1 = -2.0 * ones + jax.random.normal(k_x1, ones.shape, jnp.float32)
    x = jnp.concatenate([x0, x1], axis=0).astype(jnp.float32)   # (400, 2)

    w1, b1 = init_linear(k_l1, n_feature, n_hidden)
    w2, b2 = init_linear(k_l2, n_hidden, n_output)

    # Pad parameters once at init (hoisted out of the per-call path).
    w1_p, b1_p, w2_p, b2_p = pad_params(w1, b1, w2, b2)

    out = net_forward(x, w1_p, b1_p, w2_p, b2_p)
    out = jax.block_until_ready(out)

    # Reference check in plain JAX (unpadded parameters).
    ref = jnp.maximum(x @ w1 + b1, 0.0) @ w2 + b2
    assert out.shape == (2 * batch_per_class, n_output)
    assert jnp.allclose(out, ref, atol=1e-5, rtol=1e-5)

    print("KERNEL_OK")
</pallas_src>

<mosaic_0001>
module attributes {stable_mosaic.version = 11 : i64} {
  func.func @mlp_kernel(%arg0: i32, %arg1: memref<400x2xf32, #tpu.memory_space<vmem>>, %arg2: memref<2x128xf32, #tpu.memory_space<vmem>>, %arg3: memref<1x128xf32, #tpu.memory_space<vmem>>, %arg4: memref<128x2xf32, #tpu.memory_space<vmem>>, %arg5: memref<1x2xf32, #tpu.memory_space<vmem>>, %arg6: memref<400x2xf32, #tpu.memory_space<vmem>>) attributes {dimension_semantics = [#tpu.dimension_semantics<parallel>], iteration_bounds = array<i64: 1>, scalar_prefetch = 0 : i64, scratch_operands = 0 : i64, tpu.core_type = #tpu.core_type<tc>, window_params = [{transform_indices = @transform_0, window_bounds = array<i64: 400, 2>}, {pipeline_mode = #tpu.pipeline_mode<synchronous>, transform_indices = @transform_1, window_bounds = array<i64: 2, 128>}, {pipeline_mode = #tpu.pipeline_mode<synchronous>, transform_indices = @transform_2, window_bounds = array<i64: 1, 128>}, {pipeline_mode = #tpu.pipeline_mode<synchronous>, transform_indices = @transform_3, window_bounds = array<i64: 128, 2>}, {pipeline_mode = #tpu.pipeline_mode<synchronous>, transform_indices = @transform_4, window_bounds = array<i64: 1, 2>}, {transform_indices = @transform_5, window_bounds = array<i64: 400, 2>}]} {
    %c0 = arith.constant 0 : index
    %c0_0 = arith.constant 0 : index
    %0 = vector.load %arg1[%c0, %c0_0] : memref<400x2xf32, #tpu.memory_space<vmem>>, vector<400x2xf32>
    %1 = vector.extract_strided_slice %0 {offsets = [0, 0], sizes = [400, 1], strides = [1, 1]} : vector<400x2xf32> to vector<400x1xf32>
    %c0_1 = arith.constant 0 : index
    %c0_2 = arith.constant 0 : index
    %2 = vector.load %arg2[%c0_1, %c0_2] : memref<2x128xf32, #tpu.memory_space<vmem>>, vector<1x128xf32>
    %3 = vector.broadcast %1 : vector<400x1xf32> to vector<400x128xf32>
    %4 = vector.broadcast %2 : vector<1x128xf32> to vector<400x128xf32>
    %5 = arith.mulf %3, %4 : vector<400x128xf32>
    %6 = vector.extract_strided_slice %0 {offsets = [0, 1], sizes = [400, 1], strides = [1, 1]} : vector<400x2xf32> to vector<400x1xf32>
    %c1 = arith.constant 1 : index
    %c0_3 = arith.constant 0 : index
    %7 = vector.load %arg2[%c1, %c0_3] : memref<2x128xf32, #tpu.memory_space<vmem>>, vector<1x128xf32>
    %8 = vector.broadcast %6 : vector<400x1xf32> to vector<400x128xf32>
    %9 = vector.broadcast %7 : vector<1x128xf32> to vector<400x128xf32>
    %10 = arith.mulf %8, %9 : vector<400x128xf32>
    %11 = arith.addf %5, %10 : vector<400x128xf32>
    %c0_4 = arith.constant 0 : index
    %c0_5 = arith.constant 0 : index
    %12 = vector.load %arg3[%c0_4, %c0_5] : memref<1x128xf32, #tpu.memory_space<vmem>>, vector<1x128xf32>
    %13 = vector.broadcast %12 : vector<1x128xf32> to vector<400x128xf32>
    %14 = arith.addf %11, %13 : vector<400x128xf32>
    %cst = arith.constant 0.000000e+00 : f32
    %15 = vector.broadcast %cst : f32 to vector<400x128xf32>
    %16 = arith.maximumf %14, %15 : vector<400x128xf32>
    %c0_6 = arith.constant 0 : index
    %c0_7 = arith.constant 0 : index
    %17 = vector.load %arg4[%c0_6, %c0_7] : memref<128x2xf32, #tpu.memory_space<vmem>>, vector<128x2xf32>
    %cst_8 = arith.constant dense<0.000000e+00> : vector<400x2xf32>
    %18 = tpu.matmul %16, %17, %cst_8 {dimension_numbers = #tpu.dot_dimension_numbers<[1], [0], [0], [1], [0, 0, 1, 1], [], []>} : vector<400x128xf32>, vector<128x2xf32>, vector<400x2xf32> -> vector<400x2xf32>
    %c0_9 = arith.constant 0 : index
    %c0_10 = arith.constant 0 : index
    %19 = vector.load %arg5[%c0_9, %c0_10] : memref<1x2xf32, #tpu.memory_space<vmem>>, vector<1x2xf32>
    %20 = vector.broadcast %19 : vector<1x2xf32> to vector<400x2xf32>
    %21 = arith.addf %18, %20 : vector<400x2xf32>
    %c0_11 = arith.constant 0 : index
    %c0_12 = arith.constant 0 : index
    %22 = vector.load %arg6[%c0_11, %c0_12] : memref<400x2xf32, #tpu.memory_space<vmem>>, vector<400x2xf32>
    tpu.vector_store %arg6[%c0_11, %c0_12], %21 {strides = array<i32>} : memref<400x2xf32, #tpu.memory_space<vmem>>, vector<400x2xf32>,
    return
  }
  func.func @transform_0(%arg0: i32) -> (i32, i32) {
    %c0_i32 = arith.constant 0 : i32
    %c0_i32_0 = arith.constant 0 : i32
    return %arg0, %c0_i32 : i32, i32
  }
  func.func @transform_1(%arg0: i32) -> (i32, i32) {
    %c0_i32 = arith.constant 0 : i32
    %c0_i32_0 = arith.constant 0 : i32
    %c0_i32_1 = arith.constant 0 : i32
    return %c0_i32, %c0_i32_0 : i32, i32
  }
  func.func @transform_2(%arg0: i32) -> (i32, i32) {
    %c0_i32 = arith.constant 0 : i32
    %c0_i32_0 = arith.constant 0 : i32
    %c0_i32_1 = arith.constant 0 : i32
    return %c0_i32, %c0_i32_0 : i32, i32
  }
  func.func @transform_3(%arg0: i32) -> (i32, i32) {
    %c0_i32 = arith.constant 0 : i32
    %c0_i32_0 = arith.constant 0 : i32
    %c0_i32_1 = arith.constant 0 : i32
    return %c0_i32, %c0_i32_0 : i32, i32
  }
  func.func @transform_4(%arg0: i32) -> (i32, i32) {
    %c0_i32 = arith.constant 0 : i32
    %c0_i32_0 = arith.constant 0 : i32
    %c0_i32_1 = arith.constant 0 : i32
    return %c0_i32, %c0_i32_0 : i32, i32
  }
  func.func @transform_5(%arg0: i32) -> (i32, i32) {
    %c0_i32 = arith.constant 0 : i32
    %c0_i32_0 = arith.constant 0 : i32
    return %arg0, %c0_i32 : i32, i32
  }
}

</mosaic_0001>

<bundles_post_ra>
// kernel: net_forward.1
= control target key start
LH: loop header
LB: loop body
LE: loop exit
PB: predicated region body
PF: predicated region fallthrough
CT: control target
= control target key end

     0   :  { %v1446_v0 = vmov 1   ;;  %v1447_v1 = vmov 0   ;;  %vm1125_vm0 = vcmask 15360   ;;  %s2330_s0 = inlined_call_operand.vmem [shape: f32[400,2], index: 0, kind: input, shape index: {}]   ;;  %s2331_s3 = inlined_call_operand.vmem [shape: f32[128,2], index: 3, kind: input, shape index: {}]   ;;  %s2332_s1 = inlined_call_operand.vmem [shape: f32[2,128], index: 1, kind: input, shape index: {}]   ;;  %s2333_s2 = inlined_call_operand.vmem [shape: f32[1,128], index: 2, kind: input, shape index: {}]   ;;  %s2334_s4 = inlined_call_operand.vmem [shape: f32[1,2], index: 4, kind: input, shape index: {}]   ;;  %s2335_s5 = inlined_call_operand.vmem [shape: f32[400,2], index: 5, kind: output, shape index: {}]  }
   0x1   :  { %1408 = vset.pattern.permute.xlu0 %v1446_v0  ;;  %1407 = vset.pattern.permute.xlu1 %v1447_v1  ;;  %v22_v2 = vld [vmem:[%s2330_s0 + $0x10] sm:$0xff]  ;;  %v1486_v3 = vld [vmem:[%s2330_s0] sm:$0xff]  ;;  %v23_v4 = vld [vmem:[%s2330_s0 + $0x18] sm:$0xff] }
   0x2   :  { %83 = vperm.xlu1 %1407, %v22_v2   ;;  %377 = vperm.xlu0 %1408, %v1486_v3   ;;  %v1495_v5 = vld [vmem:[%s2330_s0 + $0x28] sm:$0xff]  ;;  %v1500_v6 = vld [vmem:[%s2330_s0 + $0xe0] sm:$0xff]  ;;  %v1507_v7 = vld [vmem:[%s2330_s0 + $0x38] sm:$0xff] }
   0x3   :  { %v1512_v8 = vld [vmem:[%s2330_s0 + $0xe8] sm:$0xff]  ;;  %v1524_v10 = vld [vmem:[%s2330_s0 + $0x30] sm:$0xff]  ;;  %v1531_v11 = vld [vmem:[%s2330_s0 + $0x58] sm:$0xff] }
   0x4   :  { %v1519_v9 = vld [vmem:[%s2330_s0 + $0x48] sm:$0xff]  ;;  %v1536_v12 = vld [vmem:[%s2330_s0 + $0x100] sm:$0xff]  ;;  %v1555_v15 = vld [vmem:[%s2330_s0 + $0x78] sm:$0xff] }
   0x5   :  { %v1543_v13 = vld [vmem:[%s2330_s0 + $0x68] sm:$0xff]  ;;  %v1560_v16 = vld [vmem:[%s2330_s0 + $0x50] sm:$0xff]  ;;  %v1567_v17 = vld [vmem:[%s2330_s0 + $0x120] sm:$0xff] }
   0x6   :  { %88 = vperm.xlu1 %1407, %v23_v4   ;;  %385 = vperm.xlu0 %1408, %v22_v2   ;;  %v1548_v14 = vld [vmem:[%s2330_s0 + $0x108] sm:$0xff]  ;;  %v46_v20 = vld [vmem:[%s2330_s0 + $0xd0] sm:$0xff]  ;;  %v1596_v22 = vld [vmem:[%s2330_s0 + $0x80] sm:$0xff] }
   0x7   :  { %v1572_v18 = vld [vmem:[%s2330_s0 + $0x8] sm:$0xff]  ;;  %v1590_v21 = vld [vmem:[%s2330_s0 + $0x70] sm:$0xff]  ;;  %v787_v23 = vld [vmem:[%s2331_s3] sm:$0xff] }
   0x8   :  { %v1580_v19 = vld [vmem:[%s2330_s0 + $0x128] sm:$0xff]  ;;  %v1609_v26 = vld [vmem:[%s2330_s0 + $0x90] sm:$0xff]  ;;  %v790_v28 = vld [vmem:[%s2331_s3 + $0x18] sm:$0xff] }
   0x9   :  { %v788_v24 = vld [vmem:[%s2331_s3 + $0x8] sm:$0xff]  ;;  %v789_v27 = vld [vmem:[%s2331_s3 + $0x10] sm:$0xff]  ;;  %v1621_v30 = vld [vmem:[%s2330_s0 + $0xd8] sm:$0xff] }
   0xa   :  { %98 = vperm.xlu1 %1407, %v1495_v5   ;;  %489 = vperm.xlu0 %1408, %v1500_v6   ;;  %v1357_v25 = vpack.c.bf16 %v788_v24, %v787_v23  ;;  %v1361_v29 = vpack.c.bf16 %v790_v28, %v789_v27  ;;  %v1626_v31 = vld [vmem:[%s2330_s0 + $0xa0] sm:$0xff]  ;;  %v792_v33 = vld [vmem:[%s2331_s3 + $0x28] sm:$0xff]  ;;  %v1642_v36 = vld [vmem:[%s2330_s0 + $0xb0] sm:$0xff] }
   0xb   :  { %v791_v32 = vld [vmem:[%s2331_s3 + $0x20] sm:$0xff]  ;;  %v793_v37 = vld [vmem:[%s2331_s3 + $0x30] sm:$0xff]  ;;  %v794_v38 = vld [vmem:[%s2331_s3 + $0x38] sm:$0xff] }
   0xc   :  { %1358 = vmatprep.subr.bf16.mxu0 %v1357_v25  ;;  %1389 = vmatprep.subr.bf16.mxu1 %v1357_v25  ;;  %v1365_v34 = vpack.c.bf16 %v792_v33, %v791_v32  ;;  %v24_v35 = vld [vmem:[%s2330_s0 + $0x20] sm:$0xff]  ;;  %v1369_v39 = vpack.c.bf16 %v794_v38, %v793_v37  ;;  %v796_v42 = vld [vmem:[%s2331_s3 + $0x48] sm:$0xff]  ;;  %v797_v44 = vld [vmem:[%s2331_s3 + $0x50] sm:$0xff] }
   0xd   :  { %1360 = vmatpush3.bf16.msra.mxu0 %v1357_v25  ;;  %1397 = vmatpush3.bf16.msra.mxu1 %v1357_v25  ;;  %v1654_v40 = vld [vmem:[%s2330_s0 + $0xc0] sm:$0xff]  ;;  %v798_v45 = vld [vmem:[%s2331_s3 + $0x58] sm:$0xff]  ;;  %v800_v48 = vld [vmem:[%s2331_s3 + $0x68] sm:$0xff] }
   0xe   :  { %108 = vperm.xlu1 %1407, %v1507_v7   ;;  %493 = vperm.xlu0 %1408, %v1512_v8   ;;  %v795_v41 = vld [vmem:[%s2331_s3 + $0x40] sm:$0xff]  ;;  %v1377_v46 = vpack.c.bf16 %v798_v45, %v797_v44  ;;  %v50_v49 = vld [vmem:[%s2330_s0 + $0xf0] sm:$0xff]  ;;  %v802_v52 = vld [vmem:[%s2331_s3 + $0x78] sm:$0xff] }
   0xf   :  { %1362 = vmatprep.subr.bf16.mxu0 %v1361_v29  ;;  %1390 = vmatprep.subr.bf16.mxu1 %v1361_v29  ;;  %v1373_v43 = vpack.c.bf16 %v796_v42, %v795_v41  ;;  %v799_v47 = vld [vmem:[%s2331_s3 + $0x60] sm:$0xff]  ;;  %v801_v51 = vld [vmem:[%s2331_s3 + $0x70] sm:$0xff]  ;;  %v51_v55 = vld [vmem:[%s2330_s0 + $0xf8] sm:$0xff] }
  0x10   :  { %v1381_v50 = vpack.c.bf16 %v800_v48, %v799_v47  ;;  %v1385_v53 = vpack.c.bf16 %v802_v52, %v801_v51  ;;  %v28_v54 = vld [vmem:[%s2330_s0 + $0x40] sm:$0xff]  ;;  %v54_v57 = vld [vmem:[%s2330_s0 + $0x110] sm:$0xff]  ;;  %v55_v58 = vld [vmem:[%s2330_s0 + $0x118] sm:$0xff] }
  0x11   :  { %1364 = vmatpush3.bf16.msra.mxu0 %v1361_v29  ;;  %1398 = vmatpush3.bf16.msra.mxu1 %v1361_v29  ;;  %v32_v56 = vld [vmem:[%s2330_s0 + $0x60] sm:$0xff]  ;;  %v59_v59 = vld [vmem:[%s2330_s0 + $0x138] sm:$0xff]  ;;  %v61_v60 = vld [vmem:[%s2330_s0 + $0x148] sm:$0xff] }
  0x12   :  { %118 = vperm.xlu1 %1407, %v1519_v9   ;;  %401 = vperm.xlu0 %1408, %v1524_v10   ;;  %v1820_v27 = vld [vmem:[%s2332_s1] ss:$0 sm:$0xff]  ;;  %v1825_v28 = vld [vmem:[%s2332_s1 + $0x1] ss:$0 sm:$0xff]  ;;  %v62_v33 = vld [vmem:[%s2330_s0 + $0x150] sm:$0xff] }
  0x13   :  { %1366 = vmatprep.subr.bf16.mxu0 %v1365_v34  ;;  %1391 = vmatprep.subr.bf16.mxu1 %v1365_v34  ;;  %v39_v44 = vld [vmem:[%s2330_s0 + $0x98] sm:$0xff] }
  0x15   :  { %1368 = vmatpush3.bf16.msra.mxu0 %v1365_v34  ;;  %1399 = vmatpush3.bf16.msra.mxu1 %v1365_v34 }
  0x16   :  { %128 = vperm.xlu1 %1407, %v1531_v11   ;;  %505 = vperm.xlu0 %1408, %v1536_v12  }
  0x17   :  { %1370 = vmatprep.subr.bf16.mxu0 %v1369_v39  ;;  %1392 = vmatprep.subr.bf16.mxu1 %v1369_v39 }
  0x19   :  { %1372 = vmatpush3.bf16.msra.mxu0 %v1369_v39  ;;  %1400 = vmatpush3.bf16.msra.mxu1 %v1369_v39 }
  0x1a   :  { %138 = vperm.xlu1 %1407, %v1543_v13   ;;  %509 = vperm.xlu0 %1408, %v1548_v14  }
  0x1b   :  { %1374 = vmatprep.subr.bf16.mxu0 %v1373_v43  ;;  %1393 = vmatprep.subr.bf16.mxu1 %v1373_v43 }
  0x1d   :  { %1376 = vmatpush3.bf16.msra.mxu0 %v1373_v43  ;;  %1401 = vmatpush3.bf16.msra.mxu1 %v1373_v43 }
  0x1e   :  { %148 = vperm.xlu1 %1407, %v1555_v15   ;;  %417 = vperm.xlu0 %1408, %v1560_v16  }
  0x1f   :  { %1378 = vmatprep.subr.bf16.mxu0 %v1377_v46  ;;  %1394 = vmatprep.subr.bf16.mxu1 %v1377_v46 }
  0x21   :  { %1380 = vmatpush3.bf16.msra.mxu0 %v1377_v46  ;;  %1402 = vmatpush3.bf16.msra.mxu1 %v1377_v46 }
  0x22   :  { %1409 = vset.pattern.permute.xlu1 %v1446_v0  ;;  %521 = vperm.xlu0 %1408, %v1567_v17  }
  0x23   :  { %381 = vperm.xlu1 %1409, %v1572_v18   ;;  %1382 = vmatprep.subr.bf16.mxu0 %v1381_v50 }
  0x24   :  { %1395 = vmatprep.subr.bf16.mxu1 %v1381_v50 }
  0x25   :  { %1384 = vmatpush3.bf16.msra.mxu0 %v1381_v50  ;;  %1403 = vmatpush3.bf16.msra.mxu1 %v1381_v50 }
  0x26   :  { %525 = vperm.xlu0 %1408, %v1580_v19   ;;  %1386 = vmatprep.subr.bf16.mxu0 %v1385_v53 }
  0x27   :  { %1410 = vset.pattern.permute.xlu1 %v1447_v1  ;;  %1396 = vmatprep.subr.bf16.mxu1 %v1385_v53 }
  0x28   :  { %203 = vperm.xlu1 %1410, %v46_v20  }
  0x29   :  { %1388 = vmatpush3.bf16.msra.mxu0 %v1385_v53  ;;  %1404 = vmatpush3.bf16.msra.mxu1 %v1385_v53 }
  0x2a   :  { %433 = vperm.xlu0 %1408, %v1590_v21  }
  0x2c   :  { %1411 = vset.pattern.permute.xlu1 %v1446_v0 }
  0x2d   :  { %481 = vperm.xlu1 %1411, %v46_v20   ;;  %v1802_v20 = vld [vmem:[%s2330_s0 + $0x188] sm:$0xff] }
  0x2e   :  { %441 = vperm.xlu0 %1408, %v1596_v22  }
  0x31   :  { %389 = vperm.xlu1 %1411, %v23_v4   ;;  %v1750_v4 = vld [vmem:[%s2330_s0 + $0x158] sm:$0xff] }
  0x32   :  { %449 = vperm.xlu0 %1408, %v1609_v26  }
  0x35   :  { %485 = vperm.xlu1 %1411, %v1621_v30  }
  0x36   :  { %457 = vperm.xlu0 %1408, %v1626_v31  }
  0x39   :  { %393 = vperm.xlu1 %1411, %v24_v35  }
  0x3a   :  { %465 = vperm.xlu0 %1408, %v1642_v36  }
  0x3d   :  { %1412 = vset.pattern.permute.xlu1 %v1447_v1 }
  0x3e   :  { %218 = vperm.xlu1 %1412, %v1512_v8   ;;  %473 = vperm.xlu0 %1408, %v1654_v40  }
  0x42   :  { %1413 = vset.pattern.permute.xlu1 %v1446_v0  ;;  %1441 = vset.pattern.permute.xlu0 %v1447_v1 }
  0x43   :  { %397 = vperm.xlu1 %1413, %v1495_v5   ;;  %73 = vperm.xlu0 %1441, %v1486_v3   ;;  %v58_v3 = vld [vmem:[%s2330_s0 + $0x130] sm:$0xff] }
  0x47   :  { %1414 = vset.pattern.permute.xlu1 %v1447_v1  ;;  %78 = vperm.xlu0 %1441, %v1572_v18  }
  0x48   :  { %223 = vperm.xlu1 %1414, %v50_v49  }
  0x4b   :  { %93 = vperm.xlu0 %1441, %v24_v35  }
  0x4c   :  { %1415 = vset.pattern.permute.xlu1 %v1446_v0 }
  0x4d   :  { %497 = vperm.xlu1 %1415, %v50_v49  }
  0x4f   :  { %103 = vperm.xlu0 %1441, %v1524_v10  }
  0x51   :  { %405 = vperm.xlu1 %1415, %v1507_v7  }
  0x53   :  { %113 = vperm.xlu0 %1441, %v28_v54  }
  0x55   :  { %501 = vperm.xlu1 %1415, %v51_v55  }
  0x57   :  { %123 = vperm.xlu0 %1441, %v1560_v16   ;;  %v1785_v16 = vld [vmem:[%s2330_s0 + $0x178] sm:$0xff] }
  0x59   :  { %409 = vperm.xlu1 %1415, %v28_v54  }
  0x5b   :  { %133 = vperm.xlu0 %1441, %v32_v56  }
  0x5d   :  { %1416 = vset.pattern.permute.xlu1 %v1447_v1 }
  0x5e   :  { %238 = vperm.xlu1 %1416, %v1548_v14   ;;  %v60_v14 = vld [vmem:[%s2330_s0 + $0x140] sm:$0xff] }
  0x5f   :  { %143 = vperm.xlu0 %1441, %v1590_v21  }
  0x62   :  { %1417 = vset.pattern.permute.xlu1 %v1446_v0 }
  0x63   :  { %413 = vperm.xlu1 %1417, %v1519_v9   ;;  %208 = vperm.xlu0 %1441, %v1621_v30   ;;  %v1766_v9 = vld [vmem:[%s2330_s0 + $0x168] sm:$0xff] }
  0x67   :  { %1418 = vset.pattern.permute.xlu1 %v1447_v1  ;;  %213 = vperm.xlu0 %1441, %v1500_v6  }
  0x68   :  { %243 = vperm.xlu1 %1418, %v54_v57  }
  0x6b   :  { %228 = vperm.xlu0 %1441, %v51_v55  }
  0x6c   :  { %1419 = vset.pattern.permute.xlu1 %v1446_v0 }
  0x6d   :  { %513 = vperm.xlu1 %1419, %v54_v57  }
  0x6f   :  { %233 = vperm.xlu0 %1441, %v1536_v12  }
  0x71   :  { %421 = vperm.xlu1 %1419, %v1531_v11  }
  0x73   :  { %248 = vperm.xlu0 %1441, %v55_v58  }
  0x75   :  { %517 = vperm.xlu1 %1419, %v55_v58  }
  0x77   :  { %253 = vperm.xlu0 %1441, %v1567_v17  }
  0x79   :  { %425 = vperm.xlu1 %1419, %v32_v56  }
  0x7b   :  { %268 = vperm.xlu0 %1441, %v59_v59  }
  0x7d   :  { %1420 = vset.pattern.permute.xlu1 %v1447_v1 }
  0x7e   :  { %258 = vperm.xlu1 %1420, %v1580_v19  }
  0x7f   :  { %153 = vperm.xlu0 %1441, %v1596_v22   ;;  %v37_v22 = vld [vmem:[%s2330_s0 + $0x88] sm:$0xff] }
  0x81   :  { %v1732_v61 = vpop.permute.xlu1 %83  ;;  %v1734_v62 = vpop.permute.xlu0 %377 }
  0x82   :  { %1421 = vset.pattern.permute.xlu1 %v1446_v0  ;;  %v580_v47 = vmul.f32 %v1825_v28, %v1734_v62  ;;  %v327_v52 = vmul.f32 %v1820_v27, %v1732_v61  ;;  %v64_v61 = vld [vmem:[%s2330_s0 + $0x160] sm:$0xff] }
  0x83   :  { %429 = vperm.xlu1 %1421, %v1543_v13   ;;  %278 = vperm.xlu0 %1441, %v61_v60  }
  0x85   :  { %v1738_v63 = vpop.permute.xlu1 %88  ;;  %v1740_v2 = vpop.permute.xlu0 %385 }
  0x86   :  { %v582_v48 = vmul.f32 %v1825_v28, %v1740_v2  ;;  %v328_v55 = vmul.f32 %v1820_v27, %v1738_v63 }
  0x87   :  { %1422 = vset.pattern.permute.xlu1 %v1447_v1  ;;  %163 = vperm.xlu0 %1441, %v1609_v26  }
  0x88   :  { %263 = vperm.xlu1 %1422, %v58_v3   ;;  %v632_v56 = vadd.f32 %v582_v48, %v327_v52  ;;  %v41_v52 = vld [vmem:[%s2330_s0 + $0xa8] sm:$0xff] }
  0x89   :  { %v1752_v5 = vpop.permute.xlu1 %98  ;;  %v1754_v6 = vpop.permute.xlu0 %489 }
  0x8b   :  { %288 = vperm.xlu0 %1441, %v1750_v4  }
  0x8c   :  { %1423 = vset.pattern.permute.xlu1 %v1446_v0 }
  0x8d   :  { %v1758_v7 = vpop.permute.xlu1 %108  ;;  %529 = vperm.xlu1 %1423, %v58_v3   ;;  %v1760_v8 = vpop.permute.xlu0 %493 }
  0x8e   :  { %v332_v48 = vmul.f32 %v1820_v27, %v1758_v7 }
  0x8f   :  { %173 = vperm.xlu0 %1441, %v1626_v31  }
  0x91   :  { %v1768_v10 = vpop.permute.xlu1 %118  ;;  %437 = vperm.xlu1 %1423, %v1555_v15   ;;  %v1771_v11 = vpop.permute.xlu0 %401 }
  0x93   :  { %298 = vperm.xlu0 %1441, %v1766_v9  }
  0x95   :  { %v1774_v12 = vpop.permute.xlu1 %128  ;;  %533 = vperm.xlu1 %1423, %v59_v59   ;;  %v1776_v13 = vpop.permute.xlu0 %505 }
  0x97   :  { %183 = vperm.xlu0 %1441, %v1642_v36   ;;  %v1837_v36 = vld [vmem:[%s2333_s2] ss:$0 sm:$0xff] }
  0x99   :  { %v1787_v15 = vpop.permute.xlu1 %138  ;;  %1424 = vset.pattern.permute.xlu1 %v1447_v1  ;;  %v1790_v17 = vpop.permute.xlu0 %509 }
  0x9a   :  { %273 = vperm.xlu1 %1424, %v60_v14  }
  0x9b   :  { %308 = vperm.xlu0 %1441, %v1785_v16  }
  0x9d   :  { %v1793_v18 = vpop.permute.xlu1 %148  ;;  %v1795_v19 = vpop.permute.xlu0 %417 }
  0x9e   :  { %1425 = vset.pattern.permute.xlu1 %v1446_v0 }
  0x9f   :  { %537 = vperm.xlu1 %1425, %v60_v14   ;;  %193 = vperm.xlu0 %1441, %v1654_v40  }
  0xa1   :  { %v1804_v21 = vpop.permute.xlu0 %521 }
  0xa2   :  { %v382_v23 = vpop.permute.xlu1 %381 }
  0xa3   :  { %1426 = vset.pattern.permute.xlu1 %v1447_v1  ;;  %318 = vperm.xlu0 %1441, %v1802_v20   ;;  %v581_v58 = vmul.f32 %v1825_v28, %v382_v23  ;;  %v330_v23 = vmul.f32 %v1820_v27, %v1752_v5 }
  0xa4   :  { %158 = vperm.xlu1 %1426, %v37_v22  }
  0xa5   :  { %v1811_v24 = vpop.permute.xlu0 %525 }
  0xa7   :  { %v204_v25 = vpop.permute.xlu1 %203  ;;  %1445 = vset.pattern.permute.xlu0 %v1446_v0 }
  0xa8   :  { %1427 = vset.pattern.permute.xlu1 %v1446_v0  ;;  %v351_v30 = vmul.f32 %v1820_v27, %v204_v25 }
  0xa9   :  { %445 = vperm.xlu1 %1427, %v37_v22   ;;  %v1815_v26 = vpop.permute.xlu0 %433  ;;  %v689_v22 = vadd.f32 %v1837_v36, %v632_v56 }
  0xab   :  { %v739_v5 = vmax.f32 %v689_v22, 0.0 }
  0xac   :  { %v482_v29 = vpop.permute.xlu1 %481 }
  0xad   :  { %v606_v31 = vmul.f32 %v1825_v28, %v482_v29  ;;  %541 = vperm.xlu1 %1427, %v61_v60   ;;  %v1829_v32 = vpop.permute.xlu0 %441 }
  0xaf   :  { %v656_v34 = vadd.f32 %v606_v31, %v351_v30 }
  0xb0   :  { %v390_v35 = vpop.permute.xlu1 %389 }
  0xb1   :  { %1428 = vset.pattern.permute.xlu1 %v1447_v1  ;;  %v1840_v37 = vpop.permute.xlu0 %449  ;;  %v713_v38 = vadd.f32 %v1837_v36, %v656_v34  ;;  %v583_v53 = vmul.f32 %v1825_v28, %v390_v35  ;;  %v586_v34 = vmul.f32 %v1825_v28, %v1771_v11 }
  0xb2   :  { %283 = vperm.xlu1 %1428, %v62_v33  }
  0xb3   :  { %v763_v39 = vmax.f32 %v713_v38, 0.0  ;;  %v633_v2 = vadd.f32 %v583_v53, %v328_v55 }
  0xb4   :  { %v1843_v40 = vpop.permute.xlu1 %485 }
  0xb5   :  { %1321 = vmatprep.mubr.f32.mxu1 %v763_v39  ;;  %v1845_v41 = vpop.permute.xlu0 %457 }
  0xb6   :  { %1429 = vset.pattern.permute.xlu1 %v1446_v0 }
  0xb7   :  { %545 = vperm.xlu1 %1429, %v62_v33   ;;  %v690_v33 = vadd.f32 %v1837_v36, %v633_v2 }
  0xb8   :  { %v394_v42 = vpop.permute.xlu1 %393 }
  0xb9   :  { %v1848_v43 = vpop.permute.xlu0 %465  ;;  %v584_v25 = vmul.f32 %v1825_v28, %v394_v42 }
  0xbb   :  { %1430 = vset.pattern.permute.xlu1 %v1447_v1 }
  0xbc   :  { %168 = vperm.xlu1 %1430, %v39_v44  }
  0xbd   :  { %v1854_v45 = vpop.permute.xlu1 %218  ;;  %v1856_v46 = vpop.permute.xlu0 %473 }
  0xc0   :  { %1431 = vset.pattern.permute.xlu1 %v1446_v0 }
  0xc1   :  { %453 = vperm.xlu1 %1431, %v39_v44  }
  0xc2   :  { %v398_v49 = vpop.permute.xlu1 %397  ;;  %v74_v50 = vpop.permute.xlu0 %73 }
  0xc3   :  { %v325_v51 = vmul.f32 %v1820_v27, %v74_v50  ;;  %v585_v3 = vmul.f32 %v1825_v28, %v398_v49  ;;  %v740_v50 = vmax.f32 %v690_v33, 0.0 }
  0xc5   :  { %549 = vperm.xlu1 %1431, %v1750_v4   ;;  %v630_v54 = vadd.f32 %v580_v47, %v325_v51  ;;  %v635_v35 = vadd.f32 %v585_v3, %v330_v23  ;;  %v590_v23 = vmul.f32 %v1825_v28, %v1795_v19  ;;  %v609_v19 = vmul.f32 %v1825_v28, %v1760_v8 }
  0xc6   :  { %v79_v57 = vpop.permute.xlu0 %78 }
  0xc7   :  { %v326_v59 = vmul.f32 %v1820_v27, %v79_v57  ;;  %v1872_v60 = vpop.permute.xlu1 %223  ;;  %v687_v62 = vadd.f32 %v1837_v36, %v630_v54  ;;  %v692_v54 = vadd.f32 %v1837_v36, %v635_v35  ;;  %v66_v35 = vld [vmem:[%s2330_s0 + $0x170] sm:$0xff] }
  0xc8   :  { %v355_v8 = vmul.f32 %v1820_v27, %v1872_v60 }
  0xc9   :  { %v631_v4 = vadd.f32 %v581_v58, %v326_v59  ;;  %1432 = vset.pattern.permute.xlu1 %v1447_v1  ;;  %v737_v63 = vmax.f32 %v687_v62, 0.0  ;;  %v742_v58 = vmax.f32 %v692_v54, 0.0 }
  0xca   :  { %293 = vperm.xlu1 %1432, %v64_v61   ;;  %v94_v14 = vpop.permute.xlu0 %93 }
  0xcb   :  { %v329_v29 = vmul.f32 %v1820_v27, %v94_v14  ;;  %1282 = vmatprep.mubr.f32.mxu0 %v737_v63  ;;  %v688_v30 = vadd.f32 %v1837_v36, %v631_v4 }
  0xcc   :  { %v498_v31 = vpop.permute.xlu1 %497 }
  0xcd   :  { %v634_v38 = vadd.f32 %v584_v25, %v329_v29  ;;  %v738_v39 = vmax.f32 %v688_v30, 0.0 }
  0xce   :  { %1433 = vset.pattern.permute.xlu1 %v1446_v0  ;;  %v104_v44 = vpop.permute.xlu0 %103 }
  0xcf   :  { %v331_v42 = vmul.f32 %v1820_v27, %v104_v44  ;;  %553 = vperm.xlu1 %1433, %v64_v61   ;;  %1283 = vmatmul.mubr.f32.vlgmr.msra.gmra.mrb[0].mxu0 %v738_v39  ;;  %v691_v47 = vadd.f32 %v1837_v36, %v634_v38  ;;  %v610_v39 = vmul.f32 %v1825_v28, %v498_v31 }
  0xd0   :  { %v406_v49 = vpop.permute.xlu1 %405  ;;  %1285 = vmatprep.mubr.f32.mxu0 %v739_v5 }
  0xd1   :  { %v636_v11 = vadd.f32 %v586_v34, %v331_v42  ;;  %v587_v51 = vmul.f32 %v1825_v28, %v406_v49  ;;  %v741_v53 = vmax.f32 %v691_v47, 0.0  ;;  %v334_v42 = vmul.f32 %v1820_v27, %v1768_v10 }
  0xd2   :  { %v114_v55 = vpop.permute.xlu0 %113  ;;  %v607_v47 = vmul.f32 %v1825_v28, %v1843_v40 }
  0xd3   :  { %v637_v56 = vadd.f32 %v587_v51, %v332_v48  ;;  %1434 = vset.pattern.permute.xlu1 %v1447_v1  ;;  %1286 = vmatmul.mubr.f32.gmra.mrb[2].mxu0 %v740_v50  ;;  %v693_v7 = vadd.f32 %v1837_v36, %v636_v11  ;;  %v333_v2 = vmul.f32 %v1820_v27, %v114_v55 }
  0xd4   :  { %178 = vperm.xlu1 %1434, %v41_v52   ;;  %v502_v57 = vpop.permute.xlu1 %501  ;;  %1288 = vmatprep.mubr.f32.mxu0 %v741_v53 }
  0xd5   :  { %v743_v59 = vmax.f32 %v693_v7, 0.0  ;;  %v694_v61 = vadd.f32 %v1837_v36, %v637_v56  ;;  %v43_v7 = vld [vmem:[%s2330_s0 + $0xb8] sm:$0xff] }
  0xd6   :  { %v124_v62 = vpop.permute.xlu0 %123 }
  0xd7   :  { %1289 = vmatmul.mubr.f32.gmra.mrb[4].mxu0 %v742_v58  ;;  %v744_v63 = vmax.f32 %v694_v61, 0.0  ;;  %v335_v25 = vmul.f32 %v1820_v27, %v124_v62 }
  0xd8   :  { %1435 = vset.pattern.permute.xlu1 %v1446_v0  ;;  %v410_v3 = vpop.permute.xlu1 %409  ;;  %1291 = vmatprep.mubr.f32.mxu0 %v743_v59  ;;  %v613_v59 = vmul.f32 %v1825_v28, %v1790_v17 }
  0xd9   :  { %v588_v4 = vmul.f32 %v1825_v28, %v410_v3  ;;  %461 = vperm.xlu1 %1435, %v41_v52   ;;  %v640_v38 = vadd.f32 %v590_v23, %v335_v25  ;;  %v660_v52 = vadd.f32 %v610_v39, %v355_v8 }
  0xda   :  { %v1905_v14 = vpop.permute.xlu0 %133 }
  0xdb   :  { %v638_v22 = vadd.f32 %v588_v4, %v333_v2  ;;  %1292 = vmatmul.mubr.f32.gmra.mrb[6].mxu0 %v744_v63  ;;  %v697_v11 = vadd.f32 %v1837_v36, %v640_v38  ;;  %v717_v3 = vadd.f32 %v1837_v36, %v660_v52  ;;  %v611_v4 = vmul.f32 %v1825_v28, %v502_v57 }
  0xdc   :  { %v612_v38 = vmul.f32 %v1825_v28, %v1776_v13 }
  0xdd   :  { %557 = vperm.xlu1 %1435, %v1766_v9   ;;  %v239_v29 = vpop.permute.xlu1 %238  ;;  %v695_v30 = vadd.f32 %v1837_v36, %v638_v22  ;;  %v354_v9 = vmul.f32 %v1820_v27, %v1854_v45  ;;  %v608_v45 = vmul.f32 %v1825_v28, %v1754_v6  ;;  %v747_v58 = vmax.f32 %v697_v11, 0.0 }
  0xde   :  { %v1912_v33 = vpop.permute.xlu0 %143  ;;  %v358_v61 = vmul.f32 %v1820_v27, %v239_v29 }
  0xdf   :  { %v745_v34 = vmax.f32 %v695_v30, 0.0  ;;  %v659_v51 = vadd.f32 %v609_v19, %v354_v9  ;;  %v767_v9 = vmax.f32 %v717_v3, 0.0 }
  0xe0   :  { %v663_v30 = vadd.f32 %v613_v59, %v358_v61 }
  0xe1   :  { %1436 = vset.pattern.permute.xlu1 %v1447_v1  ;;  %1294 = vmatprep.mubr.f32.mxu0 %v745_v34  ;;  %v716_v2 = vadd.f32 %v1837_v36, %v659_v51 }
  0xe2   :  { %303 = vperm.xlu1 %1436, %v66_v35   ;;  %v414_v44 = vpop.permute.xlu1 %413  ;;  %v209_v5 = vpop.permute.xlu0 %208  ;;  %v720_v8 = vadd.f32 %v1837_v36, %v663_v30 }
  0xe3   :  { %v589_v48 = vmul.f32 %v1825_v28, %v414_v44  ;;  %v352_v49 = vmul.f32 %v1820_v27, %v209_v5  ;;  %v766_v57 = vmax.f32 %v716_v2, 0.0 }
  0xe5   :  { %v639_v31 = vadd.f32 %v589_v48, %v334_v42  ;;  %v657_v50 = vadd.f32 %v607_v47, %v352_v49  ;;  %v336_v42 = vmul.f32 %v1820_v27, %v1774_v12 }
  0xe6   :  { %1437 = vset.pattern.permute.xlu1 %v1446_v0  ;;  %v214_v10 = vpop.permute.xlu0 %213 }
  0xe7   :  { %v353_v40 = vmul.f32 %v1820_v27, %v214_v10  ;;  %561 = vperm.xlu1 %1437, %v66_v35   ;;  %v244_v53 = vpop.permute.xlu1 %243  ;;  %v696_v54 = vadd.f32 %v1837_v36, %v639_v31  ;;  %v714_v60 = vadd.f32 %v1837_v36, %v657_v50 }
  0xe8   :  { %v359_v34 = vmul.f32 %v1820_v27, %v244_v53 }
  0xe9   :  { %v658_v55 = vadd.f32 %v608_v45, %v353_v40  ;;  %v746_v56 = vmax.f32 %v696_v54, 0.0  ;;  %v764_v6 = vmax.f32 %v714_v60, 0.0  ;;  %v616_v40 = vmul.f32 %v1825_v28, %v1804_v21 }
  0xea   :  { %v229_v62 = vpop.permute.xlu0 %228  ;;  %v770_v54 = vmax.f32 %v720_v8, 0.0  ;;  %v337_v60 = vmul.f32 %v1820_v27, %v1905_v14  ;;  %v596_v8 = vmul.f32 %v1825_v28, %v1829_v32 }
  0xeb   :  { %v356_v63 = vmul.f32 %v1820_v27, %v229_v62  ;;  %1438 = vset.pattern.permute.xlu1 %v1447_v1  ;;  %1295 = vmatmul.mubr.f32.gmra.mrb[8].mxu0 %v746_v56  ;;  %v715_v22 = vadd.f32 %v1837_v36, %v658_v55 }
  0xec   :  { %1322 = vmatmul.mubr.f32.vlgmr.msra.gmra.mrb[0].mxu1 %v764_v6  ;;  %188 = vperm.xlu1 %1438, %v43_v7   ;;  %v514_v23 = vpop.permute.xlu1 %513 }
  0xed   :  { %v661_v17 = vadd.f32 %v611_v4, %v356_v63  ;;  %v614_v25 = vmul.f32 %v1825_v28, %v514_v23  ;;  %v765_v29 = vmax.f32 %v715_v22, 0.0  ;;  %1297 = vmatprep.mubr.f32.mxu0 %v747_v58  ;;  %v617_v22 = vmul.f32 %v1825_v28, %v1811_v24 }
  0xee   :  { %v234_v35 = vpop.permute.xlu0 %233  ;;  %v594_v23 = vmul.f32 %v1825_v28, %v1815_v26 }
  0xef   :  { %v357_v19 = vmul.f32 %v1820_v27, %v234_v35  ;;  %1324 = vmatprep.mubr.f32.mxu1 %v765_v29  ;;  %v718_v39 = vadd.f32 %v1837_v36, %v661_v17  ;;  %v664_v44 = vadd.f32 %v614_v25, %v359_v34  ;;  %v339_v17 = vmul.f32 %v1820_v27, %v1912_v33  ;;  %v45_v34 = vld [vmem:[%s2330_s0 + $0xc8] sm:$0xff] }
  0xf0   :  { %1439 = vset.pattern.permute.xlu1 %v1446_v0  ;;  %v422_v5 = vpop.permute.xlu1 %421  ;;  %1325 = vmatmul.mubr.f32.gmra.mrb[2].mxu1 %v766_v57  ;;  %v338_v33 = vmul.f32 %v1820_v27, %v1787_v15 }
  0xf1   :  { %v662_v47 = vadd.f32 %v612_v38, %v357_v19  ;;  %v591_v48 = vmul.f32 %v1825_v28, %v422_v5  ;;  %469 = vperm.xlu1 %1439, %v43_v7   ;;  %1327 = vmatprep.mubr.f32.mxu1 %v767_v9  ;;  %v768_v13 = vmax.f32 %v718_v39, 0.0  ;;  %v721_v51 = vadd.f32 %v1837_v36, %v664_v44 }
  0xf2   :  { %v249_v49 = vpop.permute.xlu0 %248  ;;  %v644_v24 = vadd.f32 %v594_v23, %v339_v17 }
  0xf3   :  { %v641_v45 = vadd.f32 %v591_v48, %v336_v42  ;;  %v360_v31 = vmul.f32 %v1820_v27, %v249_v49  ;;  %v719_v50 = vadd.f32 %v1837_v36, %v662_v47  ;;  %v771_v58 = vmax.f32 %v721_v51, 0.0 }
  0xf4   :  { %v518_v11 = vpop.permute.xlu1 %517  ;;  %1328 = vmatmul.mubr.f32.gmra.mrb[4].mxu1 %v768_v13  ;;  %v701_v39 = vadd.f32 %v1837_v36, %v644_v24 }
  0xf5   :  { %v615_v12 = vmul.f32 %v1825_v28, %v518_v11  ;;  %565 = vperm.xlu1 %1439, %v1785_v16   ;;  %v769_v52 = vmax.f32 %v719_v50, 0.0  ;;  %v698_v10 = vadd.f32 %v1837_v36, %v641_v45  ;;  %v68_v16 = vld [vmem:[%s2330_s0 + $0x180] sm:$0xff]  ;;  %v340_v50 = vmul.f32 %v1820_v27, %v1793_v18 }
  0xf6   :  { %v254_v53 = vpop.permute.xlu0 %253  ;;  %v751_v15 = vmax.f32 %v701_v39, 0.0 }
  0xf7   :  { %v665_v55 = vadd.f32 %v615_v12, %v360_v31  ;;  %v361_v56 = vmul.f32 %v1820_v27, %v254_v53  ;;  %1330 = vmatprep.mubr.f32.mxu1 %v769_v52  ;;  %v748_v6 = vmax.f32 %v698_v10, 0.0 }
  0xf8   :  { %v426_v7 = vpop.permute.xlu1 %425  ;;  %1331 = vmatmul.mubr.f32.gmra.mrb[6].mxu1 %v770_v54 }
  0xf9   :  { %v666_v59 = vadd.f32 %v616_v40, %v361_v56  ;;  %v592_v21 = vmul.f32 %v1825_v28, %v426_v7  ;;  %1440 = vset.pattern.permute.xlu1 %v1447_v1  ;;  %1298 = vmatmul.mubr.f32.gmra.mrb[10].mxu0 %v748_v6  ;;  %v722_v14 = vadd.f32 %v1837_v36, %v665_v55 }
  0xfa   :  { %1333 = vmatprep.mubr.f32.mxu1 %v771_v58  ;;  %313 = vperm.xlu1 %1440, %v68_v16   ;;  %v269_v57 = vpop.permute.xlu0 %268 }
  0xfb   :  { %v642_v61 = vadd.f32 %v592_v21, %v337_v60  ;;  %v772_v62 = vmax.f32 %v722_v14, 0.0  ;;  %v723_v2 = vadd.f32 %v1837_v36, %v666_v59  ;;  %v364_v12 = vmul.f32 %v1820_v27, %v269_v57 }
  0xfd   :  { %v259_v3 = vpop.permute.xlu1 %258  ;;  %1334 = vmatmul.mubr.f32.gmra.mrb[8].mxu1 %v772_v62  ;;  %v773_v4 = vmax.f32 %v723_v2, 0.0  ;;  %v699_v63 = vadd.f32 %v1837_v36, %v642_v61 }
  0xfe   :  { %v362_v25 = vmul.f32 %v1820_v27, %v259_v3  ;;  %1442 = vset.pattern.permute.xlu1 %v1446_v0  ;;  %v154_v42 = vpop.permute.xlu0 %153 }
  0xff   :  { %569 = vperm.xlu1 %1442, %v68_v16   ;;  %1336 = vmatprep.mubr.f32.mxu1 %v773_v4  ;;  %v749_v29 = vmax.f32 %v699_v63, 0.0  ;;  %v341_v48 = vmul.f32 %v1820_v27, %v154_v42  ;;  %v598_v4 = vmul.f32 %v1825_v28, %v1840_v37 }
 0x100   :  { %v667_v30 = vadd.f32 %v617_v22, %v362_v25 }
 0x101   :  { %1300 = vmatprep.mubr.f32.mxu0 %v749_v29 }
 0x102   :  { %v430_v35 = vpop.permute.xlu1 %429  ;;  %v724_v26 = vadd.f32 %v1837_v36, %v667_v30  ;;  %v279_v6 = vpop.permute.xlu0 %278 }
 0x103   :  { %v593_v38 = vmul.f32 %v1825_v28, %v430_v35  ;;  %1443 = vset.pattern.permute.xlu1 %v1447_v1  ;;  %v366_v25 = vmul.f32 %v1820_v27, %v279_v6 }
 0x104   :  { %198 = vperm.xlu1 %1443, %v45_v34   ;;  %v774_v19 = vmax.f32 %v724_v26, 0.0 }
 0x105   :  { %v643_v9 = vadd.f32 %v593_v38, %v338_v33 }
 0x106   :  { %1337 = vmatmul.mubr.f32.gmra.mrb[10].mxu1 %v774_v19  ;;  %v164_v21 = vpop.permute.xlu0 %163 }
 0x107   :  { %v264_v44 = vpop.permute.xlu1 %263  ;;  %v700_v5 = vadd.f32 %v1837_v36, %v643_v9  ;;  %v343_v2 = vmul.f32 %v1820_v27, %v164_v21 }
 0x108   :  { %1444 = vset.pattern.permute.xlu1 %v1446_v0  ;;  %v363_v1 = vmul.f32 %v1820_v27, %v264_v44  ;;  %v646_v0 = vadd.f32 %v596_v8, %v341_v48 }
 0x109   :  { %477 = vperm.xlu1 %1444, %v45_v34   ;;  %v750_v47 = vmax.f32 %v700_v5, 0.0  ;;  %v648_v63 = vadd.f32 %v598_v4, %v343_v2 }
 0x10a   :  { %v289_v19 = vpop.permute.xlu0 %288 }
 0x10b   :  { %1301 = vmatmul.mubr.f32.gmra.mrb[12].mxu0 %v750_v47  ;;  %v705_v34 = vadd.f32 %v1837_v36, %v648_v63 }
 0x10c   :  { %v530_v13 = vpop.permute.xlu1 %529  ;;  %1303 = vmatprep.mubr.f32.mxu0 %v751_v15 }
 0x10d   :  { %v618_v49 = vmul.f32 %v1825_v28, %v530_v13  ;;  %573 = vperm.xlu1 %1444, %v1802_v20   ;;  %v703_v20 = vadd.f32 %v1837_v36, %v646_v0  ;;  %v755_v37 = vmax.f32 %v705_v34, 0.0 }
 0x10e   :  { %v174_v42 = vpop.permute.xlu0 %173 }
 0x10f   :  { %v668_v45 = vadd.f32 %v618_v49, %v363_v1  ;;  %v753_v55 = vmax.f32 %v703_v20, 0.0  ;;  %v345_v13 = vmul.f32 %v1820_v27, %v174_v42  ;;  %v600_v49 = vmul.f32 %v1825_v28, %v1845_v41 }
 0x110   :  { %v438_v31 = vpop.permute.xlu1 %437  ;;  %v604_v42 = vmul.f32 %v1825_v28, %v1856_v46 }
 0x111   :  { %v595_v11 = vmul.f32 %v1825_v28, %v438_v31  ;;  %v725_v51 = vadd.f32 %v1837_v36, %v668_v45  ;;  %v650_v8 = vadd.f32 %v600_v49, %v345_v13 }
 0x113   :  { %v645_v52 = vadd.f32 %v595_v11, %v340_v50  ;;  %v775_v10 = vmax.f32 %v725_v51, 0.0  ;;  %v707_v51 = vadd.f32 %v1837_v36, %v650_v8 }
 0x114   :  { %v534_v40 = vpop.permute.xlu1 %533 }
 0x115   :  { %v619_v53 = vmul.f32 %v1825_v28, %v534_v40  ;;  %1339 = vmatprep.mubr.f32.mxu1 %v775_v10  ;;  %v702_v32 = vadd.f32 %v1837_v36, %v645_v52  ;;  %v757_v41 = vmax.f32 %v707_v51, 0.0 }
 0x117   :  { %v669_v54 = vadd.f32 %v619_v53, %v364_v12  ;;  %v752_v60 = vmax.f32 %v702_v32, 0.0  ;;  %v368_v12 = vmul.f32 %v1820_v27, %v289_v19 }
 0x119   :  { %v274_v18 = vpop.permute.xlu1 %273  ;;  %1304 = vmatmul.mubr.f32.gmra.mrb[14].mxu0 %v752_v60  ;;  %v726_v56 = vadd.f32 %v1837_v36, %v669_v54  ;;  %v299_v54 = vpop.permute.xlu0 %298 }
 0x11a   :  { %1306 = vmatprep.mubr.f32.mxu0 %v753_v55  ;;  %v365_v58 = vmul.f32 %v1820_v27, %v274_v18 }
 0x11b   :  { %v776_v16 = vmax.f32 %v726_v56, 0.0 }
 0x11d   :  { %1340 = vmatmul.mubr.f32.gmra.mrb[12].mxu1 %v776_v16  ;;  %v184_v6 = vpop.permute.xlu0 %183 }
 0x11e   :  { %v538_v7 = vpop.permute.xlu1 %537 }
 0x11f   :  { %v620_v59 = vmul.f32 %v1825_v28, %v538_v7 }
 0x121   :  { %v670_v14 = vadd.f32 %v620_v59, %v365_v58  ;;  %v347_v59 = vmul.f32 %v1820_v27, %v184_v6 }
 0x123   :  { %v159_v61 = vpop.permute.xlu1 %158  ;;  %v727_v62 = vadd.f32 %v1837_v36, %v670_v14  ;;  %v602_v14 = vmul.f32 %v1825_v28, %v1848_v43 }
 0x124   :  { %v342_v23 = vmul.f32 %v1820_v27, %v159_v61 }
 0x125   :  { %v777_v3 = vmax.f32 %v727_v62, 0.0  ;;  %v652_v61 = vadd.f32 %v602_v14, %v347_v59 }
 0x127   :  { %1342 = vmatprep.mubr.f32.mxu1 %v777_v3 }
 0x128   :  { %v446_v22 = vpop.permute.xlu1 %445 }
 0x129   :  { %v597_v17 = vmul.f32 %v1825_v28, %v446_v22  ;;  %v709_v22 = vadd.f32 %v1837_v36, %v652_v61 }
 0x12b   :  { %v647_v29 = vadd.f32 %v597_v17, %v342_v23  ;;  %v370_v23 = vmul.f32 %v1820_v27, %v299_v54  ;;  %v759_v43 = vmax.f32 %v709_v22, 0.0 }
 0x12c   :  { %v542_v30 = vpop.permute.xlu1 %541 }
 0x12d   :  { %v621_v24 = vmul.f32 %v1825_v28, %v542_v30  ;;  %v704_v35 = vadd.f32 %v1837_v36, %v647_v29 }
 0x12f   :  { %v671_v26 = vadd.f32 %v621_v24, %v366_v25  ;;  %v754_v33 = vmax.f32 %v704_v35, 0.0  ;;  %v309_v35 = vpop.permute.xlu0 %308 }
 0x131   :  { %v284_v57 = vpop.permute.xlu1 %283  ;;  %1307 = vmatmul.mubr.f32.gmra.mrb[16].mxu0 %v754_v33  ;;  %v728_v38 = vadd.f32 %v1837_v36, %v671_v26 }
 0x132   :  { %1309 = vmatprep.mubr.f32.mxu0 %v755_v37  ;;  %v367_v44 = vmul.f32 %v1820_v27, %v284_v57 }
 0x133   :  { %v778_v9 = vmax.f32 %v728_v38, 0.0  ;;  %v194_v38 = vpop.permute.xlu0 %193 }
 0x135   :  { %1343 = vmatmul.mubr.f32.gmra.mrb[14].mxu1 %v778_v9 }
 0x136   :  { %v546_v39 = vpop.permute.xlu1 %545 }
 0x137   :  { %v622_v5 = vmul.f32 %v1825_v28, %v546_v39 }
 0x139   :  { %v672_v47 = vadd.f32 %v622_v5, %v367_v44  ;;  %v349_v44 = vmul.f32 %v1820_v27, %v194_v38 }
 0x13b   :  { %v169_v15 = vpop.permute.xlu1 %168  ;;  %v729_v48 = vadd.f32 %v1837_v36, %v672_v47  ;;  %v654_v47 = vadd.f32 %v604_v42, %v349_v44 }
 0x13c   :  { %v344_v0 = vmul.f32 %v1820_v27, %v169_v15 }
 0x13d   :  { %v779_v1 = vmax.f32 %v729_v48, 0.0  ;;  %v711_v8 = vadd.f32 %v1837_v36, %v654_v47 }
 0x13f   :  { %1345 = vmatprep.mubr.f32.mxu1 %v779_v1  ;;  %v761_v46 = vmax.f32 %v711_v8, 0.0 }
 0x140   :  { %v454_v45 = vpop.permute.xlu1 %453 }
 0x141   :  { %v599_v31 = vmul.f32 %v1825_v28, %v454_v45  ;;  %v372_v45 = vmul.f32 %v1820_v27, %v309_v35 }
 0x143   :  { %v649_v50 = vadd.f32 %v599_v31, %v344_v0 }
 0x144   :  { %v550_v11 = vpop.permute.xlu1 %549 }
 0x145   :  { %v623_v52 = vmul.f32 %v1825_v28, %v550_v11  ;;  %v706_v10 = vadd.f32 %v1837_v36, %v649_v50 }
 0x147   :  { %v673_v40 = vadd.f32 %v623_v52, %v368_v12  ;;  %v756_v20 = vmax.f32 %v706_v10, 0.0 }
 0x149   :  { %v294_v53 = vpop.permute.xlu1 %293  ;;  %1310 = vmatmul.mubr.f32.gmra.mrb[18].mxu0 %v756_v20  ;;  %v730_v32 = vadd.f32 %v1837_v36, %v673_v40 }
 0x14a   :  { %1312 = vmatprep.mubr.f32.mxu0 %v757_v41  ;;  %v369_v18 = vmul.f32 %v1820_v27, %v294_v53 }
 0x14b   :  { %v780_v60 = vmax.f32 %v730_v32, 0.0 }
 0x14d   :  { %1346 = vmatmul.mubr.f32.gmra.mrb[16].mxu1 %v780_v60 }
 0x14e   :  { %v554_v55 = vpop.permute.xlu1 %553 }
 0x14f   :  { %v624_v56 = vmul.f32 %v1825_v28, %v554_v55 }
 0x151   :  { %v674_v16 = vadd.f32 %v624_v56, %v369_v18  ;;  %v319_v56 = vpop.permute.xlu0 %318 }
 0x153   :  { %v179_v7 = vpop.permute.xlu1 %178  ;;  %v731_v58 = vadd.f32 %v1837_v36, %v674_v16 }
 0x154   :  { %v346_v2 = vmul.f32 %v1820_v27, %v179_v7  ;;  %v374_v7 = vmul.f32 %v1820_v27, %v319_v56 }
 0x155   :  { %v781_v21 = vmax.f32 %v731_v58, 0.0 }
 0x157   :  { %1348 = vmatprep.mubr.f32.mxu1 %v781_v21 }
 0x158   :  { %v462_v62 = vpop.permute.xlu1 %461 }
 0x159   :  { %v601_v3 = vmul.f32 %v1825_v28, %v462_v62 }
 0x15b   :  { %v651_v4 = vadd.f32 %v601_v3, %v346_v2  ;;  %v2078_v2 = vld [vmem:[%s2334_s4] ss:$0 sm:$0xff] }
 0x15c   :  { %v558_v63 = vpop.permute.xlu1 %557 }
 0x15d   :  { %v625_v17 = vmul.f32 %v1825_v28, %v558_v63  ;;  %v708_v25 = vadd.f32 %v1837_v36, %v651_v4 }
 0x15f   :  { %v675_v29 = vadd.f32 %v625_v17, %v370_v23  ;;  %v758_v30 = vmax.f32 %v708_v25, 0.0 }
 0x161   :  { %v304_v34 = vpop.permute.xlu1 %303  ;;  %1313 = vmatmul.mubr.f32.gmra.mrb[20].mxu0 %v758_v30  ;;  %v732_v24 = vadd.f32 %v1837_v36, %v675_v29 }
 0x162   :  { %1315 = vmatprep.mubr.f32.mxu0 %v759_v43  ;;  %v371_v37 = vmul.f32 %v1820_v27, %v304_v34 }
 0x163   :  { %v782_v26 = vmax.f32 %v732_v24, 0.0 }
 0x165   :  { %1349 = vmatmul.mubr.f32.gmra.mrb[18].mxu1 %v782_v26 }
 0x166   :  { %v562_v33 = vpop.permute.xlu1 %561 }
 0x167   :  { %v626_v57 = vmul.f32 %v1825_v28, %v562_v33 }
 0x169   :  { %v676_v19 = vadd.f32 %v626_v57, %v371_v37 }
 0x16b   :  { %v189_v9 = vpop.permute.xlu1 %188  ;;  %v733_v39 = vadd.f32 %v1837_v36, %v676_v19 }
 0x16c   :  { %v348_v48 = vmul.f32 %v1820_v27, %v189_v9 }
 0x16d   :  { %v783_v5 = vmax.f32 %v733_v39, 0.0 }
 0x16f   :  { %1351 = vmatprep.mubr.f32.mxu1 %v783_v5 }
 0x170   :  { %v470_v15 = vpop.permute.xlu1 %469 }
 0x171   :  { %v603_v13 = vmul.f32 %v1825_v28, %v470_v15 }
 0x173   :  { %v653_v1 = vadd.f32 %v603_v13, %v348_v48 }
 0x174   :  { %v566_v49 = vpop.permute.xlu1 %565 }
 0x175   :  { %v627_v0 = vmul.f32 %v1825_v28, %v566_v49  ;;  %v710_v31 = vadd.f32 %v1837_v36, %v653_v1 }
 0x177   :  { %v677_v50 = vadd.f32 %v627_v0, %v372_v45  ;;  %v760_v11 = vmax.f32 %v710_v31, 0.0 }
 0x179   :  { %v314_v51 = vpop.permute.xlu1 %313  ;;  %1316 = vmatmul.mubr.f32.gmra.mrb[22].mxu0 %v760_v11  ;;  %v734_v12 = vadd.f32 %v1837_v36, %v677_v50 }
 0x17a   :  { %1318 = vmatprep.mubr.f32.mxu0 %v761_v46  ;;  %v373_v40 = vmul.f32 %v1820_v27, %v314_v51 }
 0x17b   :  { %v784_v52 = vmax.f32 %v734_v12, 0.0 }
 0x17d   :  { %1352 = vmatmul.mubr.f32.gmra.mrb[20].mxu1 %v784_v52 }
 0x17e   :  { %v570_v10 = vpop.permute.xlu1 %569 }
 0x17f   :  { %v628_v20 = vmul.f32 %v1825_v28, %v570_v10 }
 0x181   :  { %v678_v41 = vadd.f32 %v628_v20, %v373_v40 }
 0x183   :  { %v199_v53 = vpop.permute.xlu1 %198  ;;  %v735_v32 = vadd.f32 %v1837_v36, %v678_v41 }
 0x184   :  { %v350_v55 = vmul.f32 %v1820_v27, %v199_v53 }
 0x185   :  { %v785_v54 = vmax.f32 %v735_v32, 0.0 }
 0x187   :  { %1354 = vmatprep.mubr.f32.mxu1 %v785_v54 }
 0x188   :  { %v478_v60 = vpop.permute.xlu1 %477 }
 0x189   :  { %v605_v18 = vmul.f32 %v1825_v28, %v478_v60 }
 0x18b   :  { %v655_v6 = vadd.f32 %v605_v18, %v350_v55 }
 0x18c   :  { %v574_v16 = vpop.permute.xlu1 %573 }
 0x18d   :  { %v629_v58 = vmul.f32 %v1825_v28, %v574_v16  ;;  %v712_v59 = vadd.f32 %v1837_v36, %v655_v6 }
 0x18f   :  { %v679_v21 = vadd.f32 %v629_v58, %v374_v7  ;;  %v762_v14 = vmax.f32 %v712_v59, 0.0 }
 0x191   :  { %1319 = vmatmul.mubr.f32.gmra.mrb[24].mxu0 %v762_v14  ;;  %v736_v61 = vadd.f32 %v1837_v36, %v679_v21 }
 0x193   :  { %v786_v62 = vmax.f32 %v736_v61, 0.0 }
 0x195   :  { %1355 = vmatmul.mubr.f32.gmra.mrb[22].mxu1 %v786_v62 }
 0x1a2   :  { %v1284_v3 = vpop.f32.mrb[0].mxu0 }
 0x1a3   :  { %v882_v27 = vadd.f32 %v1284_v3, %v2078_v2  ;;  %v876_v4 = vpop.f32.mrb[1].mxu0 }
 0x1a4   :  { %v877_v28 = vadd.f32 %v2078_v2, %v876_v4 }
 0x1a5   :  { %1127 = vst.msk [vmem:[%s2335_s5 + $0x8] sm:$0xff] %vm1125_vm0, %v882_v27 }
 0x1a6   :  { %1126 = vst.msk [vmem:[%s2335_s5] sm:$0xff] %vm1125_vm0, %v877_v28  ;;  %v1287_v36 = vpop.f32.mrb[2].mxu0 }
 0x1a7   :  { %v892_v63 = vadd.f32 %v1287_v36, %v2078_v2  ;;  %v886_v22 = vpop.f32.mrb[3].mxu0 }
 0x1a8   :  { %v887_v23 = vadd.f32 %v2078_v2, %v886_v22 }
 0x1a9   :  { %1129 = vst.msk [vmem:[%s2335_s5 + $0x18] sm:$0xff] %vm1125_vm0, %v892_v63 }
 0x1aa   :  { %1128 = vst.msk [vmem:[%s2335_s5 + $0x10] sm:$0xff] %vm1125_vm0, %v887_v23  ;;  %v1290_v17 = vpop.f32.mrb[4].mxu0 }
 0x1ab   :  { %v902_v25 = vadd.f32 %v1290_v17, %v2078_v2  ;;  %v896_v29 = vpop.f32.mrb[5].mxu0 }
 0x1ac   :  { %v897_v30 = vadd.f32 %v2078_v2, %v896_v29 }
 0x1ad   :  { %1131 = vst.msk [vmem:[%s2335_s5 + $0x28] sm:$0xff] %vm1125_vm0, %v902_v25 }
 0x1ae   :  { %1130 = vst.msk [vmem:[%s2335_s5 + $0x20] sm:$0xff] %vm1125_vm0, %v897_v30  ;;  %v1293_v43 = vpop.f32.mrb[6].mxu0 }
 0x1af   :  { %v912_v34 = vadd.f32 %v1293_v43, %v2078_v2  ;;  %v906_v24 = vpop.f32.mrb[7].mxu0 }
 0x1b0   :  { %v907_v35 = vadd.f32 %v2078_v2, %v906_v24 }
 0x1b1   :  { %1133 = vst.msk [vmem:[%s2335_s5 + $0x38] sm:$0xff] %vm1125_vm0, %v912_v34 }
 0x1b2   :  { %1132 = vst.msk [vmem:[%s2335_s5 + $0x30] sm:$0xff] %vm1125_vm0, %v907_v35 }
 0x1be   :  { %v1296_v26 = vpop.f32.mrb[8].mxu0 }
 0x1bf   :  { %v922_v33 = vadd.f32 %v1296_v26, %v2078_v2  ;;  %v1323_v37 = vpop.f32.mrb[0].mxu1  ;;  %v916_v57 = vpop.f32.mrb[9].mxu0 }
 0x1c0   :  { %v1012_v38 = vadd.f32 %v1323_v37, %v2078_v2  ;;  %v917_v19 = vadd.f32 %v2078_v2, %v916_v57  ;;  %v1006_v9 = vpop.f32.mrb[1].mxu1 }
 0x1c1   :  { %1135 = vst.msk [vmem:[%s2335_s5 + $0x48] sm:$0xff] %vm1125_vm0, %v922_v33  ;;  %v1007_v39 = vadd.f32 %v2078_v2, %v1006_v9 }
 0x1c2   :  { %1153 = vst.msk [vmem:[%s2335_s5 + $0xd8] sm:$0xff] %vm1125_vm0, %v1012_v38  ;;  %1134 = vst.msk [vmem:[%s2335_s5 + $0x40] sm:$0xff] %vm1125_vm0, %v917_v19 }
 0x1c3   :  { %1152 = vst.msk [vmem:[%s2335_s5 + $0xd0] sm:$0xff] %vm1125_vm0, %v1007_v39  ;;  %v1326_v44 = vpop.f32.mrb[2].mxu1 }
 0x1c4   :  { %v1022_v5 = vadd.f32 %v1326_v44, %v2078_v2  ;;  %v1016_v42 = vpop.f32.mrb[3].mxu1 }
 0x1c5   :  { %v1017_v47 = vadd.f32 %v2078_v2, %v1016_v42 }
 0x1c6   :  { %1155 = vst.msk [vmem:[%s2335_s5 + $0xe8] sm:$0xff] %vm1125_vm0, %v1022_v5 }
 0x1c7   :  { %1154 = vst.msk [vmem:[%s2335_s5 + $0xe0] sm:$0xff] %vm1125_vm0, %v1017_v47  ;;  %v1329_v15 = vpop.f32.mrb[4].mxu1 }
 0x1c8   :  { %v1032_v48 = vadd.f32 %v1329_v15, %v2078_v2  ;;  %v1026_v13 = vpop.f32.mrb[5].mxu1 }
 0x1c9   :  { %v1027_v1 = vadd.f32 %v2078_v2, %v1026_v13 }
 0x1ca   :  { %1157 = vst.msk [vmem:[%s2335_s5 + $0xf8] sm:$0xff] %vm1125_vm0, %v1032_v48 }
 0x1cb   :  { %1156 = vst.msk [vmem:[%s2335_s5 + $0xf0] sm:$0xff] %vm1125_vm0, %v1027_v1  ;;  %v1332_v49 = vpop.f32.mrb[6].mxu1 }
 0x1cc   :  { %v1042_v8 = vadd.f32 %v1332_v49, %v2078_v2  ;;  %v1299_v45 = vpop.f32.mrb[10].mxu0  ;;  %v1036_v0 = vpop.f32.mrb[7].mxu1 }
 0x1cd   :  { %v932_v31 = vadd.f32 %v1299_v45, %v2078_v2  ;;  %v1037_v50 = vadd.f32 %v2078_v2, %v1036_v0  ;;  %v926_v11 = vpop.f32.mrb[11].mxu0 }
 0x1ce   :  { %1159 = vst.msk [vmem:[%s2335_s5 + $0x108] sm:$0xff] %vm1125_vm0, %v1042_v8  ;;  %v927_v46 = vadd.f32 %v2078_v2, %v926_v11 }
 0x1cf   :  { %1137 = vst.msk [vmem:[%s2335_s5 + $0x58] sm:$0xff] %vm1125_vm0, %v932_v31  ;;  %1158 = vst.msk [vmem:[%s2335_s5 + $0x100] sm:$0xff] %vm1125_vm0, %v1037_v50 }
 0x1d0   :  { %1136 = vst.msk [vmem:[%s2335_s5 + $0x50] sm:$0xff] %vm1125_vm0, %v927_v46  ;;  %v1335_v51 = vpop.f32.mrb[8].mxu1 }
 0x1d1   :  { %v1052_v12 = vadd.f32 %v1335_v51, %v2078_v2  ;;  %v1046_v52 = vpop.f32.mrb[9].mxu1 }
 0x1d2   :  { %v1047_v10 = vadd.f32 %v2078_v2, %v1046_v52 }
 0x1d3   :  { %1161 = vst.msk [vmem:[%s2335_s5 + $0x118] sm:$0xff] %vm1125_vm0, %v1052_v12 }
 0x1d4   :  { %1160 = vst.msk [vmem:[%s2335_s5 + $0x110] sm:$0xff] %vm1125_vm0, %v1047_v10 }
 0x1d9   :  { %v1338_v40 = vpop.f32.mrb[10].mxu1 }
 0x1da   :  { %v1062_v20 = vadd.f32 %v1338_v40, %v2078_v2  ;;  %v1056_v41 = vpop.f32.mrb[11].mxu1 }
 0x1db   :  { %v1057_v53 = vadd.f32 %v2078_v2, %v1056_v41 }
 0x1dc   :  { %1163 = vst.msk [vmem:[%s2335_s5 + $0x128] sm:$0xff] %vm1125_vm0, %v1062_v20 }
 0x1dd   :  { %1162 = vst.msk [vmem:[%s2335_s5 + $0x120] sm:$0xff] %vm1125_vm0, %v1057_v53 }
 0x1de   :  { %v1302_v32 = vpop.f32.mrb[12].mxu0 }
 0x1df   :  { %v942_v54 = vadd.f32 %v1302_v32, %v2078_v2  ;;  %v936_v60 = vpop.f32.mrb[13].mxu0 }
 0x1e0   :  { %v937_v55 = vadd.f32 %v2078_v2, %v936_v60 }
 0x1e1   :  { %1139 = vst.msk [vmem:[%s2335_s5 + $0x68] sm:$0xff] %vm1125_vm0, %v942_v54 }
 0x1e2   :  { %1138 = vst.msk [vmem:[%s2335_s5 + $0x60] sm:$0xff] %vm1125_vm0, %v937_v55 }
 0x1ec   :  { %v1305_v18 = vpop.f32.mrb[14].mxu0 }
 0x1ed   :  { %v952_v56 = vadd.f32 %v1305_v18, %v2078_v2  ;;  %v946_v6 = vpop.f32.mrb[15].mxu0 }
 0x1ee   :  { %v947_v16 = vadd.f32 %v2078_v2, %v946_v6 }
 0x1ef   :  { %1141 = vst.msk [vmem:[%s2335_s5 + $0x78] sm:$0xff] %vm1125_vm0, %v952_v56 }
 0x1f0   :  { %1140 = vst.msk [vmem:[%s2335_s5 + $0x70] sm:$0xff] %vm1125_vm0, %v947_v16  ;;  %v1341_v7 = vpop.f32.mrb[12].mxu1 }
 0x1f1   :  { %v1072_v58 = vadd.f32 %v1341_v7, %v2078_v2  ;;  %v1066_v59 = vpop.f32.mrb[13].mxu1 }
 0x1f2   :  { %v1067_v21 = vadd.f32 %v2078_v2, %v1066_v59 }
 0x1f3   :  { %1165 = vst.msk [vmem:[%s2335_s5 + $0x138] sm:$0xff] %vm1125_vm0, %v1072_v58 }
 0x1f4   :  { %1164 = vst.msk [vmem:[%s2335_s5 + $0x130] sm:$0xff] %vm1125_vm0, %v1067_v21 }
 0x204   :  { %v1308_v14 = vpop.f32.mrb[16].mxu0 }
 0x205   :  { %v962_v61 = vadd.f32 %v1308_v14, %v2078_v2  ;;  %v956_v62 = vpop.f32.mrb[17].mxu0 }
 0x206   :  { %v957_v3 = vadd.f32 %v2078_v2, %v956_v62 }
 0x207   :  { %1143 = vst.msk [vmem:[%s2335_s5 + $0x88] sm:$0xff] %vm1125_vm0, %v962_v61 }
 0x208   :  { %1142 = vst.msk [vmem:[%s2335_s5 + $0x80] sm:$0xff] %vm1125_vm0, %v957_v3  ;;  %v1344_v27 = vpop.f32.mrb[14].mxu1 }
 0x209   :  { %v1082_v4 = vadd.f32 %v1344_v27, %v2078_v2  ;;  %v1076_v28 = vpop.f32.mrb[15].mxu1 }
 0x20a   :  { %v1077_v36 = vadd.f32 %v2078_v2, %v1076_v28 }
 0x20b   :  { %1167 = vst.msk [vmem:[%s2335_s5 + $0x148] sm:$0xff] %vm1125_vm0, %v1082_v4 }
 0x20c   :  { %1166 = vst.msk [vmem:[%s2335_s5 + $0x140] sm:$0xff] %vm1125_vm0, %v1077_v36 }
 0x21c   :  { %v1311_v63 = vpop.f32.mrb[18].mxu0 }
 0x21d   :  { %v972_v22 = vadd.f32 %v1311_v63, %v2078_v2  ;;  %v966_v23 = vpop.f32.mrb[19].mxu0 }
 0x21e   :  { %v967_v17 = vadd.f32 %v2078_v2, %v966_v23 }
 0x21f   :  { %1145 = vst.msk [vmem:[%s2335_s5 + $0x98] sm:$0xff] %vm1125_vm0, %v972_v22 }
 0x220   :  { %1144 = vst.msk [vmem:[%s2335_s5 + $0x90] sm:$0xff] %vm1125_vm0, %v967_v17  ;;  %v1347_v25 = vpop.f32.mrb[16].mxu1 }
 0x221   :  { %v1092_v29 = vadd.f32 %v1347_v25, %v2078_v2  ;;  %v1086_v30 = vpop.f32.mrb[17].mxu1 }
 0x222   :  { %v1087_v43 = vadd.f32 %v2078_v2, %v1086_v30 }
 0x223   :  { %1169 = vst.msk [vmem:[%s2335_s5 + $0x158] sm:$0xff] %vm1125_vm0, %v1092_v29 }
 0x224   :  { %1168 = vst.msk [vmem:[%s2335_s5 + $0x150] sm:$0xff] %vm1125_vm0, %v1087_v43 }
 0x234   :  { %v1314_v34 = vpop.f32.mrb[20].mxu0 }
 0x235   :  { %v982_v24 = vadd.f32 %v1314_v34, %v2078_v2  ;;  %v976_v35 = vpop.f32.mrb[21].mxu0 }
 0x236   :  { %v977_v26 = vadd.f32 %v2078_v2, %v976_v35 }
 0x237   :  { %1147 = vst.msk [vmem:[%s2335_s5 + $0xa8] sm:$0xff] %vm1125_vm0, %v982_v24 }
 0x238   :  { %1146 = vst.msk [vmem:[%s2335_s5 + $0xa0] sm:$0xff] %vm1125_vm0, %v977_v26  ;;  %v1350_v33 = vpop.f32.mrb[18].mxu1 }
 0x239   :  { %v1102_v37 = vadd.f32 %v1350_v33, %v2078_v2  ;;  %v1096_v57 = vpop.f32.mrb[19].mxu1 }
 0x23a   :  { %v1097_v38 = vadd.f32 %v2078_v2, %v1096_v57 }
 0x23b   :  { %1171 = vst.msk [vmem:[%s2335_s5 + $0x168] sm:$0xff] %vm1125_vm0, %v1102_v37 }
 0x23c   :  { %1170 = vst.msk [vmem:[%s2335_s5 + $0x160] sm:$0xff] %vm1125_vm0, %v1097_v38 }
 0x24c   :  { %v1317_v19 = vpop.f32.mrb[22].mxu0 }
 0x24d   :  { %v992_v9 = vadd.f32 %v1317_v19, %v2078_v2  ;;  %v986_v39 = vpop.f32.mrb[23].mxu0 }
 0x24e   :  { %v987_v44 = vadd.f32 %v2078_v2, %v986_v39 }
 0x24f   :  { %1149 = vst.msk [vmem:[%s2335_s5 + $0xb8] sm:$0xff] %vm1125_vm0, %v992_v9 }
 0x250   :  { %1148 = vst.msk [vmem:[%s2335_s5 + $0xb0] sm:$0xff] %vm1125_vm0, %v987_v44  ;;  %v1353_v5 = vpop.f32.mrb[20].mxu1 }
 0x251   :  { %v1112_v42 = vadd.f32 %v1353_v5, %v2078_v2  ;;  %v1106_v47 = vpop.f32.mrb[21].mxu1 }
 0x252   :  { %v1107_v15 = vadd.f32 %v2078_v2, %v1106_v47 }
 0x253   :  { %1173 = vst.msk [vmem:[%s2335_s5 + $0x178] sm:$0xff] %vm1125_vm0, %v1112_v42 }
 0x254   :  { %1172 = vst.msk [vmem:[%s2335_s5 + $0x170] sm:$0xff] %vm1125_vm0, %v1107_v15 }
 0x264   :  { %v1320_v48 = vpop.f32.mrb[24].mxu0 }
 0x265   :  { %v1002_v13 = vadd.f32 %v1320_v48, %v2078_v2  ;;  %v996_v1 = vpop.f32.mrb[25].mxu0 }
 0x266   :  { %v997_v49 = vadd.f32 %v2078_v2, %v996_v1 }
 0x267   :  { %1151 = vst.msk [vmem:[%s2335_s5 + $0xc8] sm:$0xff] %vm1125_vm0, %v1002_v13 }
 0x268   :  { %1150 = vst.msk [vmem:[%s2335_s5 + $0xc0] sm:$0xff] %vm1125_vm0, %v997_v49  ;;  %v1356_v8 = vpop.f32.mrb[22].mxu1 }
 0x269   :  { %v1122_v45 = vadd.f32 %v1356_v8, %v2078_v2  ;;  %v1116_v0 = vpop.f32.mrb[23].mxu1 }
 0x26a   :  { %v1117_v31 = vadd.f32 %v2078_v2, %v1116_v0 }
 0x26b   :  { %1175 = vst.msk [vmem:[%s2335_s5 + $0x188] sm:$0xff] %vm1125_vm0, %v1122_v45 }
 0x26c   :  { %1174 = vst.msk [vmem:[%s2335_s5 + $0x180] sm:$0xff] %vm1125_vm0, %v1117_v31 }

</bundles_post_ra>
